<compile_context>
chip_gen: v7x
topology: tpu7x:2x2x1
jax: 0.10.0
libtpu: 0.0.40
codegen_flags: <defaults>
</compile_context>

<pallas_src>
import jax
import jax.numpy as jnp
from jax import lax
from jax.experimental import pallas as pl
from jax.experimental.pallas import tpu as pltpu

_EPS = 1e-5


# ----------------------------- Pallas kernels ------------------------------

def _linear_bn_relu_kernel(noise_ref, cond_ref, wn_ref, wc_ref, g_ref, b_ref, o_ref):
    """ReLU(BatchNorm1d(Linear(cat([noise, cond], 1)))) with batch statistics.

    The concat is folded in as  noise @ W_noise + cond * W_cond  (the cond
    column is a depth-1 contraction, done as a VPU broadcast multiply).  The
    Linear bias is omitted: it is exactly cancelled by the BN mean subtraction.
    """
    h = jnp.dot(noise_ref[...].astype(jnp.bfloat16),
                wn_ref[...].astype(jnp.bfloat16),
                preferred_element_type=jnp.float32)            # (N, H) f32
    h = h + cond_ref[...] * wc_ref[...]                        # (N,1)*(1,H) outer product
    n = float(h.shape[0])
    s = jnp.sum(h, axis=0, keepdims=True)
    ss = jnp.sum(h * h, axis=0, keepdims=True)
    mean = s / n
    var = jnp.maximum(ss / n - mean * mean, 0.0)
    scale = g_ref[...] * lax.rsqrt(var + _EPS)
    shift = b_ref[...] - mean * scale
    o_ref[...] = jnp.maximum(h * scale + shift, 0.0)


def _upsample_stack_kernel(x0_ref, *refs):
    """5x [nearest-x2 upsample -> Conv1d -> BatchNorm1d -> ReLU] + 1x1 conv + sigmoid.

    refs = (w1,g1,b1, ..., w5,g5,b5, wf, bf, out_ref)
      w_l: (K, C_out, C_in)   g_l, b_l: (C_out, 1)
      wf : (3, C_last)        bf: (3, 1)
      out: (N, 3, L_final)    stored directly in NCL layout (L in lanes).
    """
    out_ref = refs[-1]
    prm = refs[:-1]
    n_layers = (len(prm) - 2) // 3
    wf_ref, bf_ref = prm[-2], prm[-1]
    N = x0_ref.shape[0]

    xs = [x0_ref[n] for n in range(N)]                         # per-sample (C, L) f32
    for li in range(n_layers):
        w_ref = prm[3 * li]                                    # (K, C_out, C_in)
        g_ref = prm[3 * li + 1]                                 # (C_out, 1)
        b_ref = prm[3 * li + 2]                                 # (C_out, 1)
        K, C_out, C_in = w_ref.shape
        L = xs[0].shape[1]
        pad = (K - 2) // 2
        Lp = 2 * L + 2 * pad                                   # upsampled + padded length
        L_out = Lp - K + 1

        # Nearest-neighbour x2 upsample + zero pad as a 0/1 expansion matrix
        # built from iotas (all in VMEM; nothing materialized in HBM).
        # xup_pad[:, m] = x[:, (m - pad) // 2]  for pad <= m < pad + 2L, else 0.
        r = lax.broadcasted_iota(jnp.int32, (L, Lp), 0)
        c = lax.broadcasted_iota(jnp.int32, (L, Lp), 1)
        sel = ((c - pad + 2 * L) // 2) == (r + L)              # non-negative int math
        u_bf = jnp.where(sel, 1.0, 0.0).astype(jnp.bfloat16)   # (L, Lp)

        wk_bf = [w_ref[k].astype(jnp.bfloat16) for k in range(K)]

        s = jnp.zeros((C_out, 1), jnp.float32)
        ss = jnp.zeros((C_out, 1), jnp.float32)
        ys = []
        for n in range(N):
            xup = jnp.dot(xs[n].astype(jnp.bfloat16), u_bf,
                          preferred_element_type=jnp.float32)  # (C_in, Lp)
            acc = jnp.zeros((C_out, L_out), jnp.float32)
            for k in range(K):                                 # K shifted-slice matmuls
                acc = acc + jnp.dot(
                    wk_bf[k], xup[:, k:k + L_out].astype(jnp.bfloat16),
                    preferred_element_type=jnp.float32)
            ys.append(acc)
            s = s + jnp.sum(acc, axis=1, keepdims=True)        # one-pass BN stats
            ss = ss + jnp.sum(acc * acc, axis=1, keepdims=True)

        cnt = float(N * L_out)
        mean = s / cnt
        var = jnp.maximum(ss / cnt - mean * mean, 0.0)
        scale = g_ref[...] * lax.rsqrt(var + _EPS)
        shift = b_ref[...] - mean * scale
        xs = [jnp.maximum(ys[n] * scale + shift, 0.0) for n in range(N)]

    # to_waveform: Conv1d(C_last, 3, kernel_size=1) + bias + sigmoid.
    C_last = wf_ref.shape[1]
    for n in range(N):
        if C_last == 1:
            y = wf_ref[...] * xs[n] + bf_ref[...]              # depth-1 contraction on VPU
        else:
            y = jnp.dot(wf_ref[...], xs[n],
                        preferred_element_type=jnp.float32) + bf_ref[...]
        out_ref[n] = 1.0 / (1.0 + jnp.exp(-y))


# ------------------------------- wrapper (JAX) ------------------------------

def seisgen_forward(params, noise, cond):
    if cond.ndim == 1:                                         # torch: cond.unsqueeze(1)
        cond = cond[:, None]
    N = noise.shape[0]
    H = params["lin_w_noise"].shape[1]
    cha = params["cha"]
    start_dim = params["start_dim"]

    # Call 1: Linear + BatchNorm1d + ReLU  (whole batch resident in VMEM).
    h = pl.pallas_call(
        _linear_bn_relu_kernel,
        out_shape=jax.ShapeDtypeStruct((N, H), jnp.float32),
    )(noise, cond, params["lin_w_noise"], params["lin_w_cond"],
      params["lin_bn_g"], params["lin_bn_b"])

    x0 = h.reshape(N, cha, start_dim)                          # torch .view(-1, cha, start_dim)

    # Static output-length bookkeeping (python ints only).
    ksz = params["kernel_size"]
    pad = (ksz - 2) // 2
    L = start_dim
    for _ in params["up_layers"]:
        L = 2 * L + 2 * pad - ksz + 1
    L_final = L

    layer_args = []
    for (w, g, b) in params["up_layers"]:
        layer_args += [w, g, b]

    # Call 2: full upsample/conv/BN/ReLU stack + 1x1 conv + sigmoid, fused.
    out = pl.pallas_call(
        _upsample_stack_kernel,
        out_shape=jax.ShapeDtypeStruct((N, 3, L_final), jnp.float32),
        compiler_params=pltpu.CompilerParams(vmem_limit_bytes=32 * 1024 * 1024),
    )(x0, *layer_args, params["wf"], params["bf"])
    return out


def init_params(key, cfg):
    """Parameters in kernel-ready layouts (prepared once, not per forward call)."""
    start_dim = cfg["start_dim"]
    cha = cfg["dim"]
    noise_len = cfg["noise_length"]
    ksz = cfg["kernel_size"]
    in_dim = noise_len + 1
    H = start_dim * cha
    dims = [cha, cha // 2, cha // 4, cha // 8, cha // 16, cha // 32]

    keys = jax.random.split(key, 16)
    lin_w = 0.1 * jax.random.normal(keys[0], (in_dim, H), jnp.float32)

    layers = []
    ki = 1
    for i in range(len(dims) - 1):
        c_in, c_out = dims[i], dims[i + 1]
        w = 0.1 * jax.random.normal(keys[ki], (c_out, c_in, ksz), jnp.float32); ki += 1
        g = 1.0 + 0.05 * jax.random.normal(keys[ki], (c_out,), jnp.float32); ki += 1
        b = jnp.zeros((c_out,), jnp.float32)
        # Kernel-ready: weight as (K, C_out, C_in); BN affine as (C_out, 1).
        # Conv bias omitted: exactly cancelled by the BatchNorm mean subtraction.
        layers.append((jnp.transpose(w, (2, 0, 1)),
                       g.reshape(c_out, 1),
                       b.reshape(c_out, 1)))

    wf = 0.1 * jax.random.normal(keys[ki], (3, dims[-1], 1), jnp.float32); ki += 1
    bf = 0.05 * jax.random.normal(keys[ki], (3,), jnp.float32)

    return {
        # Linear weight split so the concat([noise, cond]) never materializes;
        # Linear bias omitted (cancelled by BatchNorm mean subtraction).
        "lin_w_noise": lin_w[:noise_len],        # (noise_len, H)
        "lin_w_cond": lin_w[noise_len:],         # (1, H)
        "lin_bn_g": jnp.ones((1, H), jnp.float32),
        "lin_bn_b": jnp.zeros((1, H), jnp.float32),
        "up_layers": layers,
        "wf": wf[:, :, 0],                       # (3, C_last)   1x1 conv weight
        "bf": bf.reshape(3, 1),                  # (3, 1)
        "cha": cha,
        "start_dim": start_dim,
        "kernel_size": ksz,
    }


if __name__ == "__main__":
    # Module config: SeisGen_ACGAN_real_dist(gen_length, params) with
    # params = {start_dim: 8, dim: 32, noise_length: 16, kernel_size: 4}
    cfg = dict(start_dim=8, dim=32, noise_length=16, kernel_size=4)
    N = 2

    key = jax.random.PRNGKey(0)
    k_noise, k_cond, k_par = jax.random.split(key, 3)
    noise = jax.random.normal(k_noise, (N, cfg["noise_length"]), jnp.float32)
    cond = jax.random.uniform(k_cond, (N,), jnp.float32)       # 1-D -> exercises unsqueeze path
    params = init_params(k_par, cfg)

    out = seisgen_forward(params, noise, cond)
    out = jax.block_until_ready(out)

    # start_dim=8, k=4, pad=1: 8 -> 15 -> 29 -> 57 -> 113 -> 225
    assert out.shape == (N, 3, 225), out.shape
    assert bool(jnp.all(jnp.isfinite(out)))
    assert bool(jnp.all((out >= 0.0) & (out <= 1.0)))
    print("KERNEL_OK")
</pallas_src>

<mosaic_0001>
module attributes {stable_mosaic.version = 11 : i64} {
  func.func @_linear_bn_relu_kernel(%arg0: memref<2x16xf32, #tpu.memory_space<vmem>>, %arg1: memref<2x1xf32, #tpu.memory_space<vmem>>, %arg2: memref<16x256xf32, #tpu.memory_space<vmem>>, %arg3: memref<1x256xf32, #tpu.memory_space<vmem>>, %arg4: memref<1x256xf32, #tpu.memory_space<vmem>>, %arg5: memref<1x256xf32, #tpu.memory_space<vmem>>, %arg6: memref<2x256xf32, #tpu.memory_space<vmem>>) attributes {dimension_semantics = [], scalar_prefetch = 0 : i64, scratch_operands = 0 : i64, tpu.core_type = #tpu.core_type<tc>} {
    %c0 = arith.constant 0 : index
    %c0_0 = arith.constant 0 : index
    %0 = vector.load %arg0[%c0, %c0_0] : memref<2x16xf32, #tpu.memory_space<vmem>>, vector<2x16xf32>
    %1 = arith.truncf %0 : vector<2x16xf32> to vector<2x16xbf16>
    %c0_1 = arith.constant 0 : index
    %c0_2 = arith.constant 0 : index
    %2 = vector.load %arg2[%c0_1, %c0_2] : memref<16x256xf32, #tpu.memory_space<vmem>>, vector<16x256xf32>
    %3 = arith.truncf %2 : vector<16x256xf32> to vector<16x256xbf16>
    %cst = arith.constant dense<0.000000e+00> : vector<2x256xf32>
    %4 = tpu.matmul %1, %3, %cst {dimension_numbers = #tpu.dot_dimension_numbers<[1], [0], [0], [1], [0, 0, 1, 1], [], []>} : vector<2x16xbf16>, vector<16x256xbf16>, vector<2x256xf32> -> vector<2x256xf32>
    %c0_3 = arith.constant 0 : index
    %c0_4 = arith.constant 0 : index
    %5 = vector.load %arg1[%c0_3, %c0_4] : memref<2x1xf32, #tpu.memory_space<vmem>>, vector<2x1xf32>
    %c0_5 = arith.constant 0 : index
    %c0_6 = arith.constant 0 : index
    %6 = vector.load %arg3[%c0_5, %c0_6] : memref<1x256xf32, #tpu.memory_space<vmem>>, vector<1x256xf32>
    %7 = vector.broadcast %5 : vector<2x1xf32> to vector<2x256xf32>
    %8 = vector.broadcast %6 : vector<1x256xf32> to vector<2x256xf32>
    %9 = arith.mulf %7, %8 : vector<2x256xf32>
    %10 = arith.addf %4, %9 : vector<2x256xf32>
    %cst_7 = arith.constant dense<0.000000e+00> : vector<256xf32>
    %11 = vector.multi_reduction <add>, %10, %cst_7 [0] : vector<2x256xf32> to vector<256xf32>
    %12 = vector.shape_cast %11 : vector<256xf32> to vector<1x256xf32>
    %13 = arith.mulf %10, %10 : vector<2x256xf32>
    %cst_8 = arith.constant dense<0.000000e+00> : vector<256xf32>
    %14 = vector.multi_reduction <add>, %13, %cst_8 [0] : vector<2x256xf32> to vector<256xf32>
    %15 = vector.shape_cast %14 : vector<256xf32> to vector<1x256xf32>
    %cst_9 = arith.constant 2.000000e+00 : f32
    %16 = vector.broadcast %cst_9 : f32 to vector<1x256xf32>
    %17 = arith.divf %12, %16 : vector<1x256xf32>
    %cst_10 = arith.constant 2.000000e+00 : f32
    %18 = vector.broadcast %cst_10 : f32 to vector<1x256xf32>
    %19 = arith.divf %15, %18 : vector<1x256xf32>
    %20 = arith.mulf %17, %17 : vector<1x256xf32>
    %21 = arith.subf %19, %20 : vector<1x256xf32>
    %cst_11 = arith.constant 0.000000e+00 : f32
    %22 = vector.broadcast %cst_11 : f32 to vector<1x256xf32>
    %23 = arith.maximumf %21, %22 : vector<1x256xf32>
    %c0_12 = arith.constant 0 : index
    %c0_13 = arith.constant 0 : index
    %24 = vector.load %arg4[%c0_12, %c0_13] : memref<1x256xf32, #tpu.memory_space<vmem>>, vector<1x256xf32>
    %cst_14 = arith.constant 9.99999974E-6 : f32
    %25 = vector.broadcast %cst_14 : f32 to vector<1x256xf32>
    %26 = arith.addf %23, %25 : vector<1x256xf32>
    %27 = math.rsqrt %26 : vector<1x256xf32>
    %28 = arith.mulf %24, %27 : vector<1x256xf32>
    %c0_15 = arith.constant 0 : index
    %c0_16 = arith.constant 0 : index
    %29 = vector.load %arg5[%c0_15, %c0_16] : memref<1x256xf32, #tpu.memory_space<vmem>>, vector<1x256xf32>
    %30 = arith.mulf %17, %28 : vector<1x256xf32>
    %31 = arith.subf %29, %30 : vector<1x256xf32>
    %32 = vector.broadcast %28 : vector<1x256xf32> to vector<2x256xf32>
    %33 = arith.mulf %10, %32 : vector<2x256xf32>
    %34 = vector.broadcast %31 : vector<1x256xf32> to vector<2x256xf32>
    %35 = arith.addf %33, %34 : vector<2x256xf32>
    %cst_17 = arith.constant 0.000000e+00 : f32
    %36 = vector.broadcast %cst_17 : f32 to vector<2x256xf32>
    %37 = arith.maximumf %35, %36 : vector<2x256xf32>
    %c0_18 = arith.constant 0 : index
    %c0_19 = arith.constant 0 : index
    %38 = vector.load %arg6[%c0_18, %c0_19] : memref<2x256xf32, #tpu.memory_space<vmem>>, vector<2x256xf32>
    tpu.vector_store %arg6[%c0_18, %c0_19], %37 {strides = array<i32>} : memref<2x256xf32, #tpu.memory_space<vmem>>, vector<2x256xf32>,
    return
  }
}

</mosaic_0001>

<bundles_post_ra>
// kernel: tpu_custom_call.1
= control target key start
LH: loop header
LB: loop body
LE: loop exit
PB: predicated region body
PF: predicated region fallthrough
CT: control target
= control target key end

     0   :  { %11 = vsyncpa [#allocation3], 0  ;;  %s417_s0 = inlined_call_operand.vmem [shape: f32[2,16], index: 0, kind: input, shape index: {}]   ;;  %s418_s1 = inlined_call_operand.vmem [shape: f32[2,1], index: 1, kind: input, shape index: {}]   ;;  %s419_s2 = inlined_call_operand.hbm [shape: f32[16,256], index: 2, kind: input, shape index: {}]   ;;  %s420_s3 = inlined_call_operand.vmem [shape: f32[1,256], index: 3, kind: input, shape index: {}]   ;;  %s421_s4 = inlined_call_operand.vmem [shape: f32[1,256], index: 4, kind: input, shape index: {}]   ;;  %s422_s5 = inlined_call_operand.vmem [shape: f32[1,256], index: 5, kind: input, shape index: {}]   ;;  %s423_s6 = inlined_call_operand.hbm [shape: f32[2,256], index: 6, kind: output, shape index: {}]  }
   0x1   :  { %12 = vsyncpa [#allocation4], 0  ;;  %s316_s21 = smov [#allocation2]   ;;  %s268_s25 = scalar_lea.hbm %s419_s2, 512 }
   0x2   :  { %s22_s22 = sshll.u32 %s316_s21, 4  ;;  %p269_p0 = scmp.ne.s32.totalorder %s419_s2, %s268_s25  ;;  %s23_s22 = int_to_ptr.vmem [resolvable:$true] %s22_s22 }
   0x3   :  { %p272_p1 = scmp.lt.u32.totalorder %s268_s25, %s419_s2 }
   0x5   :  { %p274_p2 = pnand %p272_p1, %p269_p0 }
   0x7   :  { %277 = shalt.err (!%p274_p2)
}
   0x8   :  { %s278_s30 = scalar_lea.vmem %s23_s22, 512  ;;  %p283_p4 = scmp.lt.s32.totalorder %s23_s22, %s23_s22 }
   0x9   :  { %p279_p3 = scmp.ne.s32.totalorder %s23_s22, %s278_s30  ;;  %p284_p5 = scmp.lt.s32.totalorder %s278_s30, %s278_s30 }
   0xb   :  { %p285_p6 = por %p284_p5, %p283_p4 }
   0xd   :  { %p286_p7 = pnand %p285_p6, %p279_p3 }
   0xf   :  { %289 = shalt.err (!%p286_p7)
}
  0x10   :  { %s317_s7 = smov 256   ;;  %s318_s8 = smov 16  }
  0x11   :  { %28 = dma.hbm_to_vmem [thread:$0]  %s419_s2, 512, %s23_s22, [#allocation3], %s317_s7, %s317_s7, %s318_s8  }
  0x12   :  { %312 = dma.done.wait [#allocation3], 512  }
  0x13   :  { %313 = vsyncadd [#allocation3], 4294966784  ;;  %v319_v0 = vmov 0   ;;  %v42_v1 = vld [vmem:[#allocation2 + $0x8] sm:$0xff]  ;;  %v44_v2 = vld [vmem:[#allocation2 + $0x18] sm:$0xff]  ;;  %vm67_vm0 = vcmask 130048   ;;  %v55_v10 = vlaneseq }
  0x14   :  { %103 = vmatprep.mubr.bf16.mxu0 %v319_v0  ;;  %263 = vset.pattern.permute.xlu0 %v319_v0  ;;  %v41_v3 = vld [vmem:[#allocation2] sm:$0xff]  ;;  %v46_v4 = vpack.c.bf16 %v44_v2, %v42_v1  ;;  %v43_v5 = vld [vmem:[#allocation2 + $0x10] sm:$0xff]  ;;  %vm112_vm1 = vcmask 1041408  }
  0x15   :  { %v39_v6 = vld [vmem:[%s417_s0] sm:$0x3]  ;;  %v45_v8 = vpack.c.bf16 %v43_v5, %v41_v3  ;;  %v375_v11 = vshrl.u32 %v55_v10, 7 }
  0x16   :  { %v47_v7 = vld [vmem:[%s418_s1] sm:$0x3]  ;;  %71 = vmatprep.subr.bf16.mxu0 %v46_v4  ;;  %v40_v9 = vpack.c.bf16 %v39_v6, %v39_v6  ;;  %v320_v4 = vmov 1966171168  }
  0x17   :  { %51 = vperm.xlu0 %263, %v47_v7   ;;  %72 = vmatpush1.bf16.msra.mxu0 %v45_v8  ;;  %v378_v12 = vsub.s32 0, %v375_v11  ;;  %v48_v13 = vld [vmem:[%s420_s3] sm:$0x3]  ;;  %v384_v14 = vsub.s32 1, %v375_v11  ;;  %v163_v5 = vunpack.c.l.s4 %v320_v4 }
  0x19   :  { %v58_v15 = vrot.slane %v48_v13, %v378_v12  ;;  %v62_v16 = vrot.slane %v48_v13, %v384_v14  ;;  %v164_v6 = vunpack.c.0.s8 %v163_v5 }
  0x1a   :  { %255 = vmatmul.mubr.msk.bf16.vlgmr.msra.gmra.mrb[0].mxu0 %vm67_vm0, %v40_v9 }
  0x1b   :  { %v167_v8 = vsub.s32 %v164_v6, %v375_v11 }
  0x96   :  { %v52_v17 = vpop.permute.xlu0 %51 }
  0x97   :  { %v65_v18 = vmul.f32 %v58_v15, %v52_v17  ;;  %v66_v19 = vmul.f32 %v62_v16, %v52_v17  ;;  %v154_v15 = vld [vmem:[%s421_s4] sm:$0x3]  ;;  %s321_s4 = smov [#allocation5]  }
  0x98   :  { %s246_s17 = sshll.u32 %s321_s4, 4  ;;  %s247_s17 = int_to_ptr.vmem [resolvable:$true] %s246_s17 }
  0x99   :  { %s290_s18 = scalar_lea.vmem %s247_s17, 64  ;;  %p295_p9 = scmp.lt.s32.totalorder %s247_s17, %s247_s17 }
  0x9a   :  { %p291_p8 = scmp.ne.s32.totalorder %s247_s17, %s290_s18  ;;  %p296_p10 = scmp.lt.s32.totalorder %s290_s18, %s290_s18 }
  0x9c   :  { %p297_p11 = por %p296_p10, %p295_p9 }
  0x9e   :  { %p298_p12 = pnand %p297_p11, %p291_p8 }
  0xed   :  { %v105_v20 = vpop.f32.mrb[0].mxu0 }
  0xee   :  { %v388_v21 = vadd.f32 %v105_v20, %v65_v18  ;;  %v107_v22 = vpop.f32.mrb[1].mxu0 }
  0xef   :  { %v108_v23 = vadd.f32 %v107_v22, %v66_v19  ;;  %v109_v24 = vpop.f32.mrb[2].mxu0 }
  0xf0   :  { %v113_v25 = vsel %vm112_vm1, %v388_v21, 0.0  ;;  %v127_v26 = vmul.f32 %v388_v21, %v388_v21  ;;  %v110_v27 = vpop.f32.mrb[3].mxu0 }
  0xf1   :  { %v114_v28 = vrot.slane %v113_v25, 4  ;;  %v120_v29 = vsel %vm112_vm1, %v108_v23, 0.0  ;;  %v128_v30 = vmul.f32 %v108_v23, %v108_v23  ;;  %v178_v27 = vld [vmem:[%s422_s5] sm:$0x3] }
  0xf2   :  { %v129_v31 = vsel %vm112_vm1, %v127_v26, 0.0  ;;  %v121_v32 = vrot.slane %v120_v29, 4 }
  0xf3   :  { %v115_v33 = vadd.f32 %v114_v28, %v113_v25  ;;  %v130_v34 = vrot.slane %v129_v31, 4  ;;  %v136_v35 = vsel %vm112_vm1, %v128_v30, 0.0 }
  0xf4   :  { %v122_v36 = vadd.f32 %v121_v32, %v120_v29  ;;  %v137_v37 = vrot.slane %v136_v35, 4 }
  0xf5   :  { %v116_v38 = vrot.slane %v115_v33, 2  ;;  %v131_v39 = vadd.f32 %v130_v34, %v129_v31 }
  0xf6   :  { %v123_v40 = vrot.slane %v122_v36, 2  ;;  %v138_v41 = vadd.f32 %v137_v37, %v136_v35 }
  0xf7   :  { %v117_v42 = vadd.f32 %v116_v38, %v115_v33  ;;  %v132_v43 = vrot.slane %v131_v39, 2 }
  0xf8   :  { %v124_v44 = vadd.f32 %v123_v40, %v122_v36  ;;  %v139_v45 = vrot.slane %v138_v41, 2 }
  0xf9   :  { %v118_v46 = vrot.slane %v117_v42, 1  ;;  %v133_v47 = vadd.f32 %v132_v43, %v131_v39 }
  0xfa   :  { %v125_v48 = vrot.slane %v124_v44, 1  ;;  %v140_v49 = vadd.f32 %v139_v45, %v138_v41 }
  0xfb   :  { %v119_v50 = vadd.f32 %v118_v46, %v117_v42  ;;  %v134_v51 = vrot.slane %v133_v47, 1 }
  0xfc   :  { %v126_v52 = vadd.f32 %v125_v48, %v124_v44  ;;  %v141_v53 = vrot.slane %v140_v49, 1 }
  0xfd   :  { %v135_v54 = vadd.f32 %v134_v51, %v133_v47  ;;  %v144_v55 = vmul.f32 0.5, %v119_v50 }
  0xfe   :  { %v142_v56 = vadd.f32 %v141_v53, %v140_v49  ;;  %v145_v57 = vmul.f32 0.5, %v126_v52 }
  0xff   :  { %v146_v58 = vmul.f32 0.5, %v135_v54  ;;  %v148_v59 = vmul.f32 %v144_v55, %v144_v55 }
 0x100   :  { %v147_v60 = vmul.f32 0.5, %v142_v56  ;;  %v149_v61 = vmul.f32 %v145_v57, %v145_v57 }
 0x101   :  { %v150_v62 = vsub.f32 %v146_v58, %v148_v59 }
 0x102   :  { %v151_v63 = vsub.f32 %v147_v60, %v149_v61 }
 0x103   :  { %v152_v0 = vmax.f32 %v150_v62, 0.0 }
 0x104   :  { %v153_v1 = vmax.f32 %v151_v63, 0.0 }
 0x105   :  { %v155_v2 = vadd.f32 1e-05, %v152_v0 }
 0x106   :  { %v156_v3 = vadd.f32 1e-05, %v153_v1 }
 0x107   :  { %264 = vrsqrt.f32 %v155_v2 }
 0x108   :  { %266 = vrsqrt.f32 %v156_v3 }
 0x111   :  { %v265_v7 = vpop.eup %264 }
 0x112   :  { %v267_v9 = vpop.eup %266 }
 0x113   :  { %v161_v10 = vcombine.low %v265_v7, %v267_v9 }
 0x115   :  { %v168_v13 = vrot.slane %v161_v10, %v167_v8 }
 0x117   :  { %v175_v16 = vrot.slane %v168_v13, %v167_v8 }
 0x119   :  { %v177_v17 = vmul.f32 %v175_v16, %v154_v15 }
 0x11b   :  { %v187_v18 = vrot.slane %v177_v17, %v384_v14  ;;  %v183_v19 = vrot.slane %v177_v17, %v378_v12 }
 0x11d   :  { %v191_v20 = vmul.f32 %v187_v18, %v145_v57  ;;  %v212_v22 = vmul.f32 %v187_v18, %v108_v23  ;;  %v190_v24 = vmul.f32 %v183_v19, %v144_v55  ;;  %v211_v25 = vmul.f32 %v183_v19, %v388_v21 }
 0x11f   :  { %v194_v26 = vcombine.low %v190_v24, %v191_v20 }
 0x121   :  { %v201_v11 = vrot.slane %v194_v26, %v167_v8 }
 0x123   :  { %v208_v28 = vrot.slane %v201_v11, %v167_v8 }
 0x125   :  { %v210_v29 = vsub.f32 %v178_v27, %v208_v28 }
 0x127   :  { %v217_v30 = vrot.slane %v210_v29, %v378_v12  ;;  %v221_v31 = vrot.slane %v210_v29, %v384_v14 }
 0x129   :  { %v224_v32 = vadd.f32 %v217_v30, %v211_v25  ;;  %v225_v33 = vadd.f32 %v221_v31, %v212_v22 }
 0x12b   :  { %v226_v23 = vmax.f32 %v224_v32, 0.0  ;;  %v227_v34 = vmax.f32 %v225_v33, 0.0 }
 0x12d   :  { %v230_v35 = vcombine.low %v226_v23, %v227_v34 }
 0x12f   :  { %256 = vst.sshfl [vmem:[#allocation5] sm:$0x33 pattern:$0x76325410] %v230_v35 }
 0x130   :  { %301 = shalt.err (!%p298_p12)
}
 0x131   :  { %s302_s20 = scalar_lea.hbm %s423_s6, 64 }
 0x132   :  { %p303_p13 = scmp.ne.s32.totalorder %s423_s6, %s302_s20  ;;  %p306_p0 = scmp.lt.u32.totalorder %s302_s20, %s423_s6 }
 0x134   :  { %p308_p1 = pnand %p306_p0, %p303_p13 }
 0x136   :  { %311 = shalt.err (!%p308_p1)
}
 0x137   :  { %249 = dma.vmem_to_hbm [thread:$0]  %s247_s17, 64, %s423_s6, [#allocation4]  }
 0x138   :  { %314 = dma.done.wait [#allocation4], 64  }
 0x139   :  { %315 = vsyncadd [#allocation4], 4294967232 }
 0x13a   :  { %253 = vsyncpa [#allocation3], 1 }
 0x13b   :  { %254 = vsyncpa [#allocation4], 1 }

</bundles_post_ra>
